<compile_context>
chip_gen: v5e
topology: v5e:2x2
jax: 0.10.0
libtpu: 0.0.40
codegen_flags: <defaults>
</compile_context>

<pallas_src>
import functools

import jax
import jax.numpy as jnp
from jax.experimental import pallas as pl
from jax.experimental.pallas import tpu as pltpu


def _round_up(x: int, m: int) -> int:
    return ((x + m - 1) // m) * m


def _cdiv(a: int, b: int) -> int:
    return -(-a // b)


def _vmem_capacity_bytes() -> int:
    """Physical VMEM per core; conservative (v7x-sized) default if the query fails."""
    try:
        cap = getattr(pltpu.get_tpu_info(), "vmem_capacity_bytes", None)
        if cap:
            return int(cap)
    except Exception:
        pass
    return 64 * 1024 * 1024


def _sublane_multiple(dtype) -> int:
    # f32 -> 8 rows, bf16 -> 16, int8/fp8 -> 32 (sub-32-bit dtypes pack along sublanes).
    return max(8, 32 // jnp.dtype(dtype).itemsize)


def _pick_batch_tile(batch: int, theta_dim: int, backcast_size: int,
                     forecast_size: int, dtype, budget_bytes: int) -> int:
    sublane = _sublane_multiple(dtype)
    itemsize = jnp.dtype(dtype).itemsize
    # Per-row in-flight bytes: full-width input block + both output blocks, x2 buffers.
    bytes_per_row = 2 * (theta_dim + backcast_size + forecast_size) * itemsize
    tb = max(sublane, budget_bytes // max(bytes_per_row, 1))
    # Keep >= 2 grid steps when the batch allows it so both v7x TensorCores get work.
    if batch >= 2 * sublane:
        tb = min(tb, _round_up(_cdiv(batch, 2), sublane))
    if tb >= batch:
        return batch          # full batch in one block (full dim -> always legal)
    tb = max(sublane, tb - tb % sublane)
    if tb >= batch:
        return batch
    return tb


def _generic_basis_kernel(theta_ref, back_ref, fore_ref, *,
                          backcast_size: int, forecast_size: int):
    # Pure copy: column windows are static Ref slices of the full-width input block.
    theta_dim = theta_ref.shape[-1]
    back_ref[...] = theta_ref[:, :backcast_size]
    fore_ref[...] = theta_ref[:, theta_dim - forecast_size:theta_dim]


def generic_basis(theta: jax.Array, backcast_size: int, forecast_size: int):
    """Pallas implementation of GenericBasis.forward.

    theta: (batch, theta_dim). Returns (theta[:, :backcast], theta[:, -forecast:]).
    """
    batch, theta_dim = theta.shape
    assert 0 < backcast_size <= theta_dim
    # forecast_size == 0 would differ from torch's `theta[:, -0:]` (full tensor).
    assert 0 < forecast_size <= theta_dim

    phys_vmem = _vmem_capacity_bytes()
    buffer_budget = (phys_vmem * 3) // 8      # double-buffered working-set budget
    vmem_limit = (phys_vmem * 3) // 4         # scoped limit, consistent with budget

    tb = _pick_batch_tile(batch, theta_dim, backcast_size, forecast_size,
                          theta.dtype, buffer_budget)
    nsteps = _cdiv(batch, tb)

    spec_kwargs = {}
    if nsteps >= 8:
        # Zero-compute body on a long grid -> keep more DMAs in flight.
        spec_kwargs["pipeline_mode"] = pl.Buffered(3)

    in_specs = [pl.BlockSpec((tb, theta_dim), lambda i: (i, 0), **spec_kwargs)]
    out_specs = (
        pl.BlockSpec((tb, backcast_size), lambda i: (i, 0), **spec_kwargs),
        pl.BlockSpec((tb, forecast_size), lambda i: (i, 0), **spec_kwargs),
    )
    out_shape = (
        jax.ShapeDtypeStruct((batch, backcast_size), theta.dtype),
        jax.ShapeDtypeStruct((batch, forecast_size), theta.dtype),
    )
    kernel = functools.partial(_generic_basis_kernel,
                               backcast_size=backcast_size,
                               forecast_size=forecast_size)

    return pl.pallas_call(
        kernel,
        grid=(nsteps,),
        out_shape=out_shape,
        in_specs=in_specs,
        out_specs=out_specs,
        compiler_params=pltpu.CompilerParams(
            dimension_semantics=("parallel",),   # v7x: shard batch grid over 2 TCs
            vmem_limit_bytes=vmem_limit,
        ),
    )(theta)


if __name__ == "__main__":
    root = jax.random.PRNGKey(0)
    k1, k2, k3 = jax.random.split(root, 3)

    # Case 1: typical small generic block (theta_dim == backcast + forecast),
    # single grid step, unaligned forecast start.
    backcast_size, forecast_size = 16, 8
    batch = 8
    theta_dim = backcast_size + forecast_size
    theta = jax.random.normal(k1, (batch, theta_dim), dtype=jnp.float32)
    back, fore = generic_basis(theta, backcast_size, forecast_size)
    jax.block_until_ready((back, fore))
    assert back.shape == (batch, backcast_size)
    assert fore.shape == (batch, forecast_size)
    assert jnp.array_equal(back, theta[:, :backcast_size])
    assert jnp.array_equal(fore, theta[:, -forecast_size:])

    # Case 2: large batch, theta_dim > backcast + forecast, ragged final block
    # (exercises batch tiling, the 2-step "parallel" grid, and OOB padding).
    b2, f2 = 12, 8
    td2 = 24
    batch2 = 1000
    theta2 = jax.random.normal(k2, (batch2, td2), dtype=jnp.float32)
    back2, fore2 = generic_basis(theta2, b2, f2)
    jax.block_until_ready((back2, fore2))
    assert jnp.array_equal(back2, theta2[:, :b2])
    assert jnp.array_equal(fore2, theta2[:, -f2:])

    # Case 3: bf16 (exercises dtype-aware 16-row sublane tiling).
    b3, f3 = 20, 12
    td3 = 32
    batch3 = 32
    theta3 = jax.random.normal(k3, (batch3, td3), dtype=jnp.bfloat16)
    back3, fore3 = generic_basis(theta3, b3, f3)
    jax.block_until_ready((back3, fore3))
    assert jnp.array_equal(back3, theta3[:, :b3])
    assert jnp.array_equal(fore3, theta3[:, -f3:])

    print("KERNEL_OK")
</pallas_src>

<mosaic_0001>
module attributes {stable_mosaic.version = 11 : i64} {
  func.func @_generic_basis_kernel(%arg0: i32, %arg1: memref<8x24xf32, #tpu.memory_space<vmem>>, %arg2: memref<8x16xf32, #tpu.memory_space<vmem>>, %arg3: memref<8x8xf32, #tpu.memory_space<vmem>>) attributes {dimension_semantics = [#tpu.dimension_semantics<parallel>], iteration_bounds = array<i64: 1>, scalar_prefetch = 0 : i64, scratch_operands = 0 : i64, tpu.core_type = #tpu.core_type<tc>, window_params = [{transform_indices = @transform_0, window_bounds = array<i64: 8, 24>}, {transform_indices = @transform_1, window_bounds = array<i64: 8, 16>}, {transform_indices = @transform_2, window_bounds = array<i64: 8, 8>}]} {
    %c0 = arith.constant 0 : index
    %c0_0 = arith.constant 0 : index
    %0 = vector.load %arg1[%c0, %c0_0] : memref<8x24xf32, #tpu.memory_space<vmem>>, vector<8x16xf32>
    %c0_1 = arith.constant 0 : index
    %c0_2 = arith.constant 0 : index
    %1 = vector.load %arg2[%c0_1, %c0_2] : memref<8x16xf32, #tpu.memory_space<vmem>>, vector<8x16xf32>
    tpu.vector_store %arg2[%c0_1, %c0_2], %0 {strides = array<i32>} : memref<8x16xf32, #tpu.memory_space<vmem>>, vector<8x16xf32>,
    %c0_3 = arith.constant 0 : index
    %c16 = arith.constant 16 : index
    %2 = vector.load %arg1[%c0_3, %c16] : memref<8x24xf32, #tpu.memory_space<vmem>>, vector<8x8xf32>
    %c0_4 = arith.constant 0 : index
    %c0_5 = arith.constant 0 : index
    %3 = vector.load %arg3[%c0_4, %c0_5] : memref<8x8xf32, #tpu.memory_space<vmem>>, vector<8x8xf32>
    tpu.vector_store %arg3[%c0_4, %c0_5], %2 {strides = array<i32>} : memref<8x8xf32, #tpu.memory_space<vmem>>, vector<8x8xf32>,
    return
  }
  func.func @transform_0(%arg0: i32) -> (i32, i32) {
    %c0_i32 = arith.constant 0 : i32
    %c0_i32_0 = arith.constant 0 : i32
    return %arg0, %c0_i32 : i32, i32
  }
  func.func @transform_1(%arg0: i32) -> (i32, i32) {
    %c0_i32 = arith.constant 0 : i32
    %c0_i32_0 = arith.constant 0 : i32
    return %arg0, %c0_i32 : i32, i32
  }
  func.func @transform_2(%arg0: i32) -> (i32, i32) {
    %c0_i32 = arith.constant 0 : i32
    %c0_i32_0 = arith.constant 0 : i32
    return %arg0, %c0_i32 : i32, i32
  }
}

</mosaic_0001>

<bundles_post_ra>
// kernel: tpu_custom_call.1
= control target key start
LH: loop header
LB: loop body
LE: loop exit
PB: predicated region body
PF: predicated region fallthrough
CT: control target
= control target key end

     0   :  { %8 = vsyncpa [#allocation3], 0  ;;  %s179_s0 = inlined_call_operand.hbm [shape: f32[8,24], index: 0, kind: input, shape index: {}]   ;;  %s180_s1 = inlined_call_operand.hbm [shape: f32[8,16], index: 1, kind: output, shape index: {0}]   ;;  %s181_s2 = inlined_call_operand.hbm [shape: f32[8,8], index: 2, kind: output, shape index: {1}]  }
   0x1   :  { %9 = vsyncpa [#allocation4], 0 }
   0x2   :  { %10 = vsyncpa [#allocation7], 0  ;;  %s16_s11 = sshll.u32 %s179_s0, 4  ;;  %s151_s12 = smov [#allocation2]   ;;  %s17_s11 = int_to_ptr.hbm [resolvable:$true] %s16_s11 }
   0x3   :  { %s18_s13 = sshll.u32 %s151_s12, 4  ;;  %s19_s13 = int_to_ptr.vmem [resolvable:$true] %s18_s13 }
   0x4   :  { %21 = dma.hbm_to_vmem [thread:$0]  %s17_s11, 128, %s19_s13, [#allocation3]  }
   0x5   :  { %145 = dma.done.wait [#allocation3], 128  }
   0x6   :  { %146 = vsyncadd [#allocation3], 4294967168  ;;  %v29_v0 = vld [vmem:[#allocation2] sm:$0xff]  ;;  %s152_s14 = smov 112   ;;  %s153_s15 = smov [#allocation5]   ;;  %vm27_vm0 = vcmask 130048  }
   0x7   :  { %31 = vrot.lane.b32.xlu0 %v29_v0, %s152_s14  ;;  %s41_s16 = sshll.u32 %s153_s15, 4  ;;  %s43_s19 = sshll.u32 %s180_s1, 4  ;;  %28 = vst.msk [vmem:[#allocation5] sm:$0xff] %vm27_vm0, %v29_v0  ;;  %vm34_vm1 = vcmask 64512   ;;  %s42_s16 = int_to_ptr.vmem [resolvable:$true] %s41_s16  ;;  %s44_s19 = int_to_ptr.hbm [resolvable:$true] %s43_s19 }
   0x8   :  { %46 = dma.vmem_to_hbm [thread:$0]  %s42_s16, 128, %s44_s19, [#allocation4]  }
   0x9   :  { %s154_s0 = smov [#allocation6]   ;;  %s54_s23 = sshll.u32 %s181_s2, 4  ;;  %s55_s23 = int_to_ptr.hbm [resolvable:$true] %s54_s23 }
   0xa   :  { %s52_s20 = sshll.u32 %s154_s0, 4  ;;  %s53_s20 = int_to_ptr.vmem [resolvable:$true] %s52_s20 }
  0x79   :  { %v32_v1 = vpop.permute.xlu0 %31 }
  0x7a   :  { %35 = vst.msk [vmem:[#allocation6] sm:$0xff] %vm34_vm1, %v32_v1 }
  0x7b   :  { %57 = dma.vmem_to_hbm [thread:$0]  %s53_s20, 128, %s55_s23, [#allocation7]  }
  0x7c   :  { %147 = dma.done.wait [#allocation4], 128  }
  0x7d   :  { %148 = vsyncadd [#allocation4], 4294967168 }
  0x7e   :  { %149 = dma.done.wait [#allocation7], 128  }
  0x7f   :  { %150 = vsyncadd [#allocation7], 4294967168 }
  0x80   :  { %66 = vsyncpa [#allocation3], 1 }
  0x81   :  { %67 = vsyncpa [#allocation4], 1 }
  0x82   :  { %68 = vsyncpa [#allocation7], 1 }

</bundles_post_ra>
